<compile_context>
chip_gen: v6e
topology: v6e:2x2x1
jax: 0.10.0
libtpu: 0.0.40
codegen_flags: <defaults>
</compile_context>

<pallas_src>
import functools
import math

import jax
import jax.numpy as jnp
import numpy as np
from jax.experimental import pallas as pl
from jax.experimental.pallas import tpu as pltpu

_LANES = 128
_TARGET_TILE_BYTES = 1536 * 1024   # ~1.5 MiB per streamed input buffer


@functools.lru_cache(maxsize=None)
def _detect_num_tensorcores():
    """Best-effort TC-per-device count; conservative default 1 (v5e/v6e)."""
    try:
        info = pltpu.get_tpu_info()
        for name in ("num_tensorcores", "tensorcore_count", "num_cores",
                     "cores_per_chip", "num_cores_per_chip"):
            v = getattr(info, name, None)
            if isinstance(v, int) and v >= 1:
                return min(v, 2)
    except Exception:
        pass
    try:
        v = getattr(jax.devices()[0], "num_cores", None)
        if isinstance(v, int) and v >= 1:
            return min(v, 2)
    except Exception:
        pass
    return 1


def _make_loss_kernel(*, tile_rows, inner, n_tiles, n_valid, exact):
    tile_elems = tile_rows * _LANES
    folds = tile_rows // 8
    last = n_tiles - 1

    def _contrib(x_ref, t_ref, w_ref):
        x = x_ref[...].astype(jnp.float32)        # (tile_rows, 128)
        t = t_ref[...].astype(jnp.float32)        # (tile_rows, 128)
        w07 = w_ref[...].astype(jnp.float32)      # (1,128) or (tile_rows,128): 0.7*w

        # One EUP exp per element, reused for BCE tail and sigmoid.
        e = jnp.exp(-jnp.abs(x))                  # exp(-|x|) in (0, 1]
        d = 1.0 + e
        r = pl.reciprocal(d, approx=True)         # EUP vrcp (approx)
        r = r * (2.0 - d * r)                     # one Newton step -> ~f32 exact (VPU)
        # Stable BCE-with-logits: max(x,0) - x*t + log1p(exp(-|x|))
        bce = jnp.maximum(x, 0.0) - x * t + jnp.log1p(e)
        p = jnp.where(x >= 0.0, r, e * r)         # sigmoid(x) from the same exp
        ompt = p + t - 2.0 * p * t                # == 1 - p_t
        # Fused: bce * (0.7*w + 0.3*(1-p_t)^2); 0.7*w precomputed in the slab.
        return bce * (w07 + 0.3 * (ompt * ompt))

    def _fold(v):                                 # (tile_rows,128) -> (1,8,128), VPU adds only
        return jnp.sum(v.reshape(folds, 8, _LANES), axis=0).reshape(1, 8, _LANES)

    def kernel(x_ref, t_ref, w_ref, out_ref):
        c = pl.program_id(0)
        i = pl.program_id(1)

        @pl.when(i == 0)
        def _init():
            out_ref[...] = jnp.zeros_like(out_ref)

        if exact:
            out_ref[...] += _fold(_contrib(x_ref, t_ref, w_ref))
        else:
            gt = c * inner + i                    # global tile index

            @pl.when(gt < last)                   # interior tiles: no mask work at all
            def _bulk():
                out_ref[...] += _fold(_contrib(x_ref, t_ref, w_ref))

            @pl.when(gt == last)                  # only the last real tile is masked
            def _tail():
                v = _contrib(x_ref, t_ref, w_ref)
                rem = n_valid - last * tile_elems          # python int in (0, tile_elems]
                rid = jax.lax.broadcasted_iota(jnp.int32, (tile_rows, _LANES), 0)
                lid = jax.lax.broadcasted_iota(jnp.int32, (tile_rows, _LANES), 1)
                keep = (rid * _LANES + lid) < rem          # local index: no int32 overflow
                out_ref[...] += _fold(jnp.where(keep, v, 0.0))
            # Tiles with gt > last (overflow from the 2-core split) are skipped.

    return kernel


def optimized_multilabel_loss(outputs, targets, class_weights, *,
                              target_tile_bytes=_TARGET_TILE_BYTES,
                              num_cores=None):
    """0.7 * mean(bce * w[class]) + 0.3 * mean(bce * (1 - p_t)**2).

    outputs, targets: (B, C) in any float/int dtype — they are streamed in their
    native dtype (bf16 logits / int8 targets halve or quarter HBM traffic); the
    kernel casts to f32 in-register.  class_weights: (C,) float.
    """
    B, C = outputs.shape
    n_valid = B * C
    w07 = 0.7 * jnp.asarray(class_weights, dtype=jnp.float32).reshape(-1)

    # ---- lane-dense packing: every shape becomes (rows, 128) ----
    g = math.gcd(C, _LANES)
    period = C // g                                   # weight-pattern period, in rows
    unit = (8 * period) // math.gcd(8, period)        # lcm(8, period): tile_rows granularity

    rows = -(-n_valid // _LANES)
    x = outputs.reshape(-1)
    t = targets.reshape(-1)
    if rows * _LANES != n_valid:
        # TODO(synk): only hit when B*C % 128 != 0 (reshape needs divisibility);
        # the pad contents are irrelevant — they are masked out in-kernel.
        pad = rows * _LANES - n_valid
        x = jnp.pad(x, (0, pad))
        t = jnp.pad(t, (0, pad))
    x = x.reshape(rows, _LANES)
    t = t.reshape(rows, _LANES)
    if rows < unit:                                   # tiny input: 8-sublane-align the single tile
        x = jnp.pad(x, ((0, unit - rows), (0, 0)))
        t = jnp.pad(t, ((0, unit - rows), (0, 0)))
        rows = unit

    # ---- tile size by bytes (~1.5 MiB per streamed input buffer) ----
    itemsize = max(jnp.dtype(outputs.dtype).itemsize, jnp.dtype(targets.dtype).itemsize)
    target_rows = max(unit, target_tile_bytes // (_LANES * itemsize))
    tile_rows = max(unit, (target_rows // unit) * unit)
    tile_rows = min(tile_rows, (rows // unit) * unit)
    n_tiles = -(-rows // tile_rows)

    # ---- outer "parallel" split only when there really are 2 TensorCores ----
    if num_cores is None:
        num_cores = _detect_num_tensorcores()
    outer = 2 if (num_cores >= 2 and n_tiles >= 2) else 1
    inner = -(-n_tiles // outer)

    tile_elems = tile_rows * _LANES
    exact = (n_valid == outer * inner * tile_elems)   # no masking needed anywhere

    # ---- per-element class weights, pre-scaled by 0.7, resident in VMEM ----
    if period == 1:                                   # 128 % C == 0: one broadcast row
        w_slab = jnp.tile(w07, _LANES // C).reshape(1, _LANES)
    else:                                             # general C: full-lane weight slab
        w_slab = jnp.tile(w07, tile_elems // C).reshape(tile_rows, _LANES)
    slab_rows = w_slab.shape[0]

    kernel = _make_loss_kernel(tile_rows=tile_rows, inner=inner, n_tiles=n_tiles,
                               n_valid=n_valid, exact=exact)

    last_block = n_tiles - 1
    row_map = lambda c, i: (jnp.minimum(c * inner + i, last_block), 0)

    partials = pl.pallas_call(
        kernel,
        out_shape=jax.ShapeDtypeStruct((outer, 8, _LANES), jnp.float32),
        grid_spec=pltpu.PrefetchScalarGridSpec(
            num_scalar_prefetch=0,
            grid=(outer, inner),
            in_specs=[
                pl.BlockSpec((tile_rows, _LANES), row_map),
                pl.BlockSpec((tile_rows, _LANES), row_map),
                pl.BlockSpec((slab_rows, _LANES), lambda c, i: (0, 0)),
            ],
            out_specs=pl.BlockSpec((1, 8, _LANES), lambda c, i: (c, 0, 0)),
        ),
        compiler_params=pltpu.CompilerParams(
            dimension_semantics=("parallel", "arbitrary"),
            vmem_limit_bytes=32 * 1024 * 1024),
    )(x, t, w_slab)

    # Per-core (8,128) partials -> single cross-lane reduce + mean, once.
    return jnp.sum(partials) / jnp.float32(n_valid)


def make_class_weights(class_frequencies):
    """Deterministic __init__ logic from the PyTorch module."""
    cf = jnp.asarray(class_frequencies, dtype=jnp.float32)
    total_samples = cf.sum()
    return total_samples / (cf.shape[0] * cf + 1.0)


def _reference_loss(outputs, targets, class_weights):
    x = outputs.astype(jnp.float32)
    t = targets.astype(jnp.float32)
    w = jnp.asarray(class_weights, jnp.float32)
    bce = jnp.maximum(x, 0.0) - x * t + jnp.log1p(jnp.exp(-jnp.abs(x)))
    p = jax.nn.sigmoid(x)
    p_t = p * t + (1 - p) * (1 - t)
    return 0.7 * (bce * w[None, :]).mean() + 0.3 * (bce * (1 - p_t) ** 2).mean()


if __name__ == "__main__":
    base_key = jax.random.PRNGKey(0)

    def run_check(B, C, dtype, **kw):
        k = jax.random.fold_in(base_key, B * 1000 + C)
        kx, kt = jax.random.split(k)
        class_frequencies = np.arange(1, C + 1, dtype=np.float32) * 10.0
        class_weights = make_class_weights(class_frequencies)
        outputs = (jax.random.normal(kx, (B, C), dtype=jnp.float32) * 2.0).astype(dtype)
        targets = (jax.random.uniform(kt, (B, C)) > 0.5).astype(dtype)

        loss = jax.block_until_ready(
            optimized_multilabel_loss(outputs, targets, class_weights, **kw))
        ref = _reference_loss(outputs, targets, class_weights)
        assert jnp.allclose(loss, ref, rtol=5e-5, atol=5e-5), (B, C, str(dtype), loss, ref)

    # Primary small case (batch=8, classes=16): lane-dense, single masked tile.
    run_check(8, 16, jnp.float32)
    # Odd shapes (C does not divide 128): flat tail + resident weight-slab path.
    run_check(37, 13, jnp.float32)
    # Native bf16 inputs streamed straight into the kernel (no f32 copies).
    run_check(8, 16, jnp.bfloat16)
    # Multi-tile grid with forced 2-TensorCore split: ragged last tile,
    # overflow-tile skip, and per-core partial accumulators.
    run_check(288, 16, jnp.float32, target_tile_bytes=8 * _LANES * 4, num_cores=2)
    # Multi-tile, single core, exact-coverage (fully unmasked) path.
    run_check(256, 16, jnp.float32, target_tile_bytes=8 * _LANES * 4, num_cores=1)

    print("KERNEL_OK")
</pallas_src>

<mosaic_0001>
module attributes {stable_mosaic.version = 11 : i64} {
  func.func @kernel(%arg0: i32, %arg1: i32, %arg2: memref<8x128xf32, #tpu.memory_space<vmem>>, %arg3: memref<8x128xf32, #tpu.memory_space<vmem>>, %arg4: memref<1x128xf32, #tpu.memory_space<vmem>>, %arg5: memref<1x8x128xf32, #tpu.memory_space<vmem>>) attributes {dimension_semantics = [#tpu.dimension_semantics<parallel>, #tpu.dimension_semantics<arbitrary>], iteration_bounds = array<i64: 1, 1>, scalar_prefetch = 0 : i64, scratch_operands = 0 : i64, tpu.core_type = #tpu.core_type<tc>, window_params = [{transform_indices = @transform_0, window_bounds = array<i64: 8, 128>}, {transform_indices = @transform_1, window_bounds = array<i64: 8, 128>}, {pipeline_mode = #tpu.pipeline_mode<synchronous>, transform_indices = @transform_2, window_bounds = array<i64: 1, 128>}, {transform_indices = @transform_3, window_bounds = array<i64: 1, 8, 128>}]} {
    %c0_i32 = arith.constant 0 : i32
    %0 = arith.cmpi eq, %arg1, %c0_i32 : i32
    %1 = arith.extui %0 : i1 to i32
    %c0_i32_0 = arith.constant 0 : i32
    %2 = arith.cmpi ne, %1, %c0_i32_0 : i32
    scf.if %2 {
      %cst = arith.constant 0.000000e+00 : f32
      %11 = vector.broadcast %cst : f32 to vector<1x8x128xf32>
      %c0 = arith.constant 0 : index
      %c0_5 = arith.constant 0 : index
      %c0_6 = arith.constant 0 : index
      %12 = vector.load %arg5[%c0, %c0_5, %c0_6] : memref<1x8x128xf32, #tpu.memory_space<vmem>>, vector<1x8x128xf32>
      tpu.vector_store %arg5[%c0, %c0_5, %c0_6], %11 {strides = array<i32>} : memref<1x8x128xf32, #tpu.memory_space<vmem>>, vector<1x8x128xf32>,
    } else {
    }
    %c1_i32 = arith.constant 1 : i32
    %3 = arith.muli %arg0, %c1_i32 : i32
    %4 = arith.addi %3, %arg1 : i32
    %c0_i32_1 = arith.constant 0 : i32
    %5 = arith.cmpi slt, %4, %c0_i32_1 : i32
    %6 = arith.extui %5 : i1 to i32
    %c0_i32_2 = arith.constant 0 : i32
    %7 = arith.cmpi ne, %6, %c0_i32_2 : i32
    scf.if %7 {
      %c0 = arith.constant 0 : index
      %c0_5 = arith.constant 0 : index
      %c0_6 = arith.constant 0 : index
      %11 = vector.load %arg5[%c0, %c0_5, %c0_6] : memref<1x8x128xf32, #tpu.memory_space<vmem>>, vector<1x8x128xf32>
      %c0_7 = arith.constant 0 : index
      %c0_8 = arith.constant 0 : index
      %12 = vector.load %arg2[%c0_7, %c0_8] : memref<8x128xf32, #tpu.memory_space<vmem>>, vector<8x128xf32>
      %c0_9 = arith.constant 0 : index
      %c0_10 = arith.constant 0 : index
      %13 = vector.load %arg3[%c0_9, %c0_10] : memref<8x128xf32, #tpu.memory_space<vmem>>, vector<8x128xf32>
      %c0_11 = arith.constant 0 : index
      %c0_12 = arith.constant 0 : index
      %14 = vector.load %arg4[%c0_11, %c0_12] : memref<1x128xf32, #tpu.memory_space<vmem>>, vector<1x128xf32>
      %15 = math.absf %12 : vector<8x128xf32>
      %cst = arith.constant 0.000000e+00 : f32
      %16 = vector.broadcast %cst : f32 to vector<8x128xf32>
      %17 = arith.subf %16, %15 : vector<8x128xf32>
      %18 = math.exp %17 : vector<8x128xf32>
      %cst_13 = arith.constant 1.000000e+00 : f32
      %19 = vector.broadcast %cst_13 : f32 to vector<8x128xf32>
      %20 = arith.addf %19, %18 : vector<8x128xf32>
      %21 = tpu.reciprocal %20 {approx = true} : vector<8x128xf32> -> vector<8x128xf32>
      %22 = arith.mulf %20, %21 : vector<8x128xf32>
      %cst_14 = arith.constant 2.000000e+00 : f32
      %23 = vector.broadcast %cst_14 : f32 to vector<8x128xf32>
      %24 = arith.subf %23, %22 : vector<8x128xf32>
      %25 = arith.mulf %21, %24 : vector<8x128xf32>
      %cst_15 = arith.constant 0.000000e+00 : f32
      %26 = vector.broadcast %cst_15 : f32 to vector<8x128xf32>
      %27 = arith.maximumf %12, %26 : vector<8x128xf32>
      %28 = arith.mulf %12, %13 : vector<8x128xf32>
      %29 = arith.subf %27, %28 : vector<8x128xf32>
      %30 = math.log1p %18 : vector<8x128xf32>
      %31 = arith.addf %29, %30 : vector<8x128xf32>
      %cst_16 = arith.constant 0.000000e+00 : f32
      %32 = vector.broadcast %cst_16 : f32 to vector<8x128xf32>
      %33 = arith.cmpf oge, %12, %32 : vector<8x128xf32>
      %34 = arith.mulf %18, %25 : vector<8x128xf32>
      %35 = arith.select %33, %25, %34 : vector<8x128xi1>, vector<8x128xf32>
      %36 = arith.addf %35, %13 : vector<8x128xf32>
      %cst_17 = arith.constant 2.000000e+00 : f32
      %37 = vector.broadcast %cst_17 : f32 to vector<8x128xf32>
      %38 = arith.mulf %37, %35 : vector<8x128xf32>
      %39 = arith.mulf %38, %13 : vector<8x128xf32>
      %40 = arith.subf %36, %39 : vector<8x128xf32>
      %41 = arith.mulf %40, %40 : vector<8x128xf32>
      %cst_18 = arith.constant 3.000000e-01 : f32
      %42 = vector.broadcast %cst_18 : f32 to vector<8x128xf32>
      %43 = arith.mulf %42, %41 : vector<8x128xf32>
      %44 = vector.broadcast %14 : vector<1x128xf32> to vector<8x128xf32>
      %45 = arith.addf %44, %43 : vector<8x128xf32>
      %46 = arith.mulf %31, %45 : vector<8x128xf32>
      %47 = vector.shape_cast %46 : vector<8x128xf32> to vector<1x8x128xf32>
      %cst_19 = arith.constant dense<0.000000e+00> : vector<8x128xf32>
      %48 = vector.multi_reduction <add>, %47, %cst_19 [0] : vector<1x8x128xf32> to vector<8x128xf32>
      %49 = vector.shape_cast %48 : vector<8x128xf32> to vector<1x8x128xf32>
      %50 = arith.addf %11, %49 : vector<1x8x128xf32>
      %c0_20 = arith.constant 0 : index
      %c0_21 = arith.constant 0 : index
      %c0_22 = arith.constant 0 : index
      %51 = vector.load %arg5[%c0_20, %c0_21, %c0_22] : memref<1x8x128xf32, #tpu.memory_space<vmem>>, vector<1x8x128xf32>
      tpu.vector_store %arg5[%c0_20, %c0_21, %c0_22], %50 {strides = array<i32>} : memref<1x8x128xf32, #tpu.memory_space<vmem>>, vector<1x8x128xf32>,
    } else {
    }
    %c0_i32_3 = arith.constant 0 : i32
    %8 = arith.cmpi eq, %4, %c0_i32_3 : i32
    %9 = arith.extui %8 : i1 to i32
    %c0_i32_4 = arith.constant 0 : i32
    %10 = arith.cmpi ne, %9, %c0_i32_4 : i32
    scf.if %10 {
      %c0 = arith.constant 0 : index
      %c0_5 = arith.constant 0 : index
      %11 = vector.load %arg2[%c0, %c0_5] : memref<8x128xf32, #tpu.memory_space<vmem>>, vector<8x128xf32>
      %c0_6 = arith.constant 0 : index
      %c0_7 = arith.constant 0 : index
      %12 = vector.load %arg3[%c0_6, %c0_7] : memref<8x128xf32, #tpu.memory_space<vmem>>, vector<8x128xf32>
      %c0_8 = arith.constant 0 : index
      %c0_9 = arith.constant 0 : index
      %13 = vector.load %arg4[%c0_8, %c0_9] : memref<1x128xf32, #tpu.memory_space<vmem>>, vector<1x128xf32>
      %14 = math.absf %11 : vector<8x128xf32>
      %cst = arith.constant 0.000000e+00 : f32
      %15 = vector.broadcast %cst : f32 to vector<8x128xf32>
      %16 = arith.subf %15, %14 : vector<8x128xf32>
      %17 = math.exp %16 : vector<8x128xf32>
      %cst_10 = arith.constant 1.000000e+00 : f32
      %18 = vector.broadcast %cst_10 : f32 to vector<8x128xf32>
      %19 = arith.addf %18, %17 : vector<8x128xf32>
      %20 = tpu.reciprocal %19 {approx = true} : vector<8x128xf32> -> vector<8x128xf32>
      %21 = arith.mulf %19, %20 : vector<8x128xf32>
      %cst_11 = arith.constant 2.000000e+00 : f32
      %22 = vector.broadcast %cst_11 : f32 to vector<8x128xf32>
      %23 = arith.subf %22, %21 : vector<8x128xf32>
      %24 = arith.mulf %20, %23 : vector<8x128xf32>
      %cst_12 = arith.constant 0.000000e+00 : f32
      %25 = vector.broadcast %cst_12 : f32 to vector<8x128xf32>
      %26 = arith.maximumf %11, %25 : vector<8x128xf32>
      %27 = arith.mulf %11, %12 : vector<8x128xf32>
      %28 = arith.subf %26, %27 : vector<8x128xf32>
      %29 = math.log1p %17 : vector<8x128xf32>
      %30 = arith.addf %28, %29 : vector<8x128xf32>
      %cst_13 = arith.constant 0.000000e+00 : f32
      %31 = vector.broadcast %cst_13 : f32 to vector<8x128xf32>
      %32 = arith.cmpf oge, %11, %31 : vector<8x128xf32>
      %33 = arith.mulf %17, %24 : vector<8x128xf32>
      %34 = arith.select %32, %24, %33 : vector<8x128xi1>, vector<8x128xf32>
      %35 = arith.addf %34, %12 : vector<8x128xf32>
      %cst_14 = arith.constant 2.000000e+00 : f32
      %36 = vector.broadcast %cst_14 : f32 to vector<8x128xf32>
      %37 = arith.mulf %36, %34 : vector<8x128xf32>
      %38 = arith.mulf %37, %12 : vector<8x128xf32>
      %39 = arith.subf %35, %38 : vector<8x128xf32>
      %40 = arith.mulf %39, %39 : vector<8x128xf32>
      %cst_15 = arith.constant 3.000000e-01 : f32
      %41 = vector.broadcast %cst_15 : f32 to vector<8x128xf32>
      %42 = arith.mulf %41, %40 : vector<8x128xf32>
      %43 = vector.broadcast %13 : vector<1x128xf32> to vector<8x128xf32>
      %44 = arith.addf %43, %42 : vector<8x128xf32>
      %45 = arith.mulf %30, %44 : vector<8x128xf32>
      %46 = tpu.iota {dimensions = array<i32: 0>} : vector<8x128xi32>
      %47 = tpu.iota {dimensions = array<i32: 1>} : vector<8x128xi32>
      %c128_i32 = arith.constant 128 : i32
      %48 = vector.broadcast %c128_i32 : i32 to vector<8x128xi32>
      %49 = arith.muli %46, %48 : vector<8x128xi32>
      %50 = arith.addi %49, %47 : vector<8x128xi32>
      %c128_i32_16 = arith.constant 128 : i32
      %51 = vector.broadcast %c128_i32_16 : i32 to vector<8x128xi32>
      %52 = arith.cmpi slt, %50, %51 : vector<8x128xi32>
      %c0_17 = arith.constant 0 : index
      %c0_18 = arith.constant 0 : index
      %c0_19 = arith.constant 0 : index
      %53 = vector.load %arg5[%c0_17, %c0_18, %c0_19] : memref<1x8x128xf32, #tpu.memory_space<vmem>>, vector<1x8x128xf32>
      %cst_20 = arith.constant 0.000000e+00 : f32
      %54 = vector.broadcast %cst_20 : f32 to vector<8x128xf32>
      %55 = arith.select %52, %45, %54 : vector<8x128xi1>, vector<8x128xf32>
      %56 = vector.shape_cast %55 : vector<8x128xf32> to vector<1x8x128xf32>
      %cst_21 = arith.constant dense<0.000000e+00> : vector<8x128xf32>
      %57 = vector.multi_reduction <add>, %56, %cst_21 [0] : vector<1x8x128xf32> to vector<8x128xf32>
      %58 = vector.shape_cast %57 : vector<8x128xf32> to vector<1x8x128xf32>
      %59 = arith.addf %53, %58 : vector<1x8x128xf32>
      %c0_22 = arith.constant 0 : index
      %c0_23 = arith.constant 0 : index
      %c0_24 = arith.constant 0 : index
      %60 = vector.load %arg5[%c0_22, %c0_23, %c0_24] : memref<1x8x128xf32, #tpu.memory_space<vmem>>, vector<1x8x128xf32>
      tpu.vector_store %arg5[%c0_22, %c0_23, %c0_24], %59 {strides = array<i32>} : memref<1x8x128xf32, #tpu.memory_space<vmem>>, vector<1x8x128xf32>,
    } else {
    }
    return
  }
  func.func @transform_0(%arg0: i32, %arg1: i32) -> (i32, i32) {
    %c1_i32 = arith.constant 1 : i32
    %0 = arith.muli %arg0, %c1_i32 : i32
    %1 = arith.addi %0, %arg1 : i32
    %c0_i32 = arith.constant 0 : i32
    %2 = arith.minsi %1, %c0_i32 : i32
    %c0_i32_0 = arith.constant 0 : i32
    %c0_i32_1 = arith.constant 0 : i32
    return %2, %c0_i32_0 : i32, i32
  }
  func.func @transform_1(%arg0: i32, %arg1: i32) -> (i32, i32) {
    %c1_i32 = arith.constant 1 : i32
    %0 = arith.muli %arg0, %c1_i32 : i32
    %1 = arith.addi %0, %arg1 : i32
    %c0_i32 = arith.constant 0 : i32
    %2 = arith.minsi %1, %c0_i32 : i32
    %c0_i32_0 = arith.constant 0 : i32
    %c0_i32_1 = arith.constant 0 : i32
    return %2, %c0_i32_0 : i32, i32
  }
  func.func @transform_2(%arg0: i32, %arg1: i32) -> (i32, i32) {
    %c0_i32 = arith.constant 0 : i32
    %c0_i32_0 = arith.constant 0 : i32
    %c0_i32_1 = arith.constant 0 : i32
    return %c0_i32, %c0_i32_0 : i32, i32
  }
  func.func @transform_3(%arg0: i32, %arg1: i32) -> (i32, i32, i32) {
    %c0_i32 = arith.constant 0 : i32
    %c0_i32_0 = arith.constant 0 : i32
    %c0_i32_1 = arith.constant 0 : i32
    return %arg0, %c0_i32, %c0_i32_0 : i32, i32, i32
  }
}

</mosaic_0001>

<bundles_post_ra>
// kernel: tpu_custom_call.1
= control target key start
LH: loop header
LB: loop body
LE: loop exit
PB: predicated region body
PF: predicated region fallthrough
CT: control target
= control target key end

     0   :  { %8 = vsyncpa [#allocation3], 0  ;;  %s302_s0 = inlined_call_operand.hbm [shape: f32[8,128], index: 0, kind: input, shape index: {}]   ;;  %s303_s1 = inlined_call_operand.hbm [shape: f32[8,128], index: 1, kind: input, shape index: {}]   ;;  %s304_s2 = inlined_call_operand.vmem [shape: f32[1,128], index: 2, kind: input, shape index: {}]   ;;  %s305_s3 = inlined_call_operand.hbm [shape: f32[1,8,128], index: 3, kind: output, shape index: {}]  }
   0x1   :  { %9 = vsyncpa [#allocation6], 0 }
   0x2   :  { %10 = vsyncpa [#allocation4], 0  ;;  %s267_s12 = smov [#allocation2]   ;;  %s268_s14 = smov [#allocation5]  }
   0x3   :  { %s22_s13 = sshll.u32 %s267_s12, 4  ;;  %s37_s15 = sshll.u32 %s268_s14, 4  ;;  %s23_s13 = int_to_ptr.vmem [resolvable:$true] %s22_s13  ;;  %s38_s15 = int_to_ptr.vmem [resolvable:$true] %s37_s15 }
   0x4   :  { %s209_s16 = scalar_lea.vmem %s23_s13, 128  ;;  %p214_p1 = scmp.lt.s32.totalorder %s23_s13, %s23_s13 }
   0x5   :  { %p210_p0 = scmp.ne.s32.totalorder %s23_s13, %s209_s16  ;;  %p215_p2 = scmp.lt.s32.totalorder %s209_s16, %s209_s16 }
   0x7   :  { %p216_p3 = por %p215_p2, %p214_p1 }
   0x9   :  { %p217_p4 = pnand %p216_p3, %p210_p0 }
   0xb   :  { %220 = shalt.err (!%p217_p4)
}
   0xc   :  { %25 = dma.hbm_to_vmem [thread:$0]  %s302_s0, 128, %s23_s13, [#allocation3]  }
   0xd   :  { %s229_s19 = scalar_lea.vmem %s38_s15, 128  ;;  %p234_p6 = scmp.lt.s32.totalorder %s38_s15, %s38_s15 }
   0xe   :  { %p230_p5 = scmp.ne.s32.totalorder %s38_s15, %s229_s19  ;;  %p235_p7 = scmp.lt.s32.totalorder %s229_s19, %s229_s19 }
  0x10   :  { %p236_p8 = por %p235_p7, %p234_p6 }
  0x12   :  { %p237_p9 = pnand %p236_p8, %p230_p5 }
  0x14   :  { %240 = shalt.err (!%p237_p9)
}
  0x15   :  { %40 = dma.hbm_to_vmem [thread:$0]  %s303_s1, 128, %s38_s15, [#allocation6]  }
  0x16   :  { %261 = dma.done.wait [#allocation3], 128  }
  0x17   :  { %262 = vsyncadd [#allocation3], 4294967168 }
  0x18   :  { %263 = dma.done.wait [#allocation6], 128  }
  0x19   :  { %264 = vsyncadd [#allocation6], 4294967168  ;;  %v115_v0 = vld [vmem:[#allocation2] sm:$0xff]  ;;  %v157_v11 = vlaneseq  ;;  %v116_v12 = vld [vmem:[#allocation5] sm:$0xff]  ;;  %s269_s22 = smov [#allocation7]  }
  0x1a   :  { %v118_v1 = vand.u32 2147483647, %v115_v0  ;;  %vm140_vm0 = vcmp.ge.f32.partialorder %v115_v0, 0.0  ;;  %v127_v19 = vmax.f32 %v115_v0, 0.0  ;;  %v128_v20 = vmul.f32 %v116_v12, %v115_v0  ;;  %v190_v32 = vld [vmem:[%s304_s2] ss:$0 sm:$0xff] }
  0x1b   :  { %v158_v18 = vshrl.u32 %v157_v11, 7  ;;  %v160_v26 = vand.u32 127, %v157_v11  ;;  %s175_s23 = sshll.u32 %s269_s22, 4  ;;  %s176_s23 = int_to_ptr.vmem [resolvable:$true] %s175_s23 }
  0x1c   :  { %v119_v2 = vsub.f32 0.0, %v118_v1  ;;  %v129_v28 = vsub.f32 %v127_v19, %v128_v20  ;;  %s241_s24 = scalar_lea.vmem %s176_s23, 128  ;;  %p246_p11 = scmp.lt.s32.totalorder %s176_s23, %s176_s23 }
  0x1d   :  { %v161_v27 = vmul.u32 128, %v158_v18  ;;  %p242_p10 = scmp.ne.s32.totalorder %s176_s23, %s241_s24  ;;  %p247_p12 = scmp.lt.s32.totalorder %s241_s24, %s241_s24 }
  0x1e   :  { %v120_v3 = vmul.f32 1.442695, %v119_v2 }
  0x1f   :  { %v162_v33 = vadd.s32 %v161_v27, %v160_v26  ;;  %p248_p13 = por %p247_p12, %p246_p11 }
  0x20   :  { %195 = vpow2.f32 %v120_v3 }
  0x21   :  { %vm163_vm2 = vcmp.lt.s32.totalorder %v162_v33, 128  ;;  %p249_p0 = pnand %p248_p13, %p242_p10 }
  0x2d   :  { %v196_v4 = vpop.eup %195 }
  0x2e   :  { %v122_v5 = vadd.f32 1.0, %v196_v4  ;;  %v133_v9 = vmul.f32 -0.5, %v196_v4  ;;  %v136_v16 = vand.u32 2147483647, %v196_v4 }
  0x30   :  { %197 = vrcp.f32 %v122_v5  ;;  %v134_v13 = vadd.f32 1.0, %v133_v9  ;;  %vm137_vm1 = vcmp.lt.f32.partialorder %v136_v16, 0.0004427343 }
  0x31   :  { %199 = vlog2.f32 %v122_v5 }
  0x32   :  { %v135_v24 = vmul.f32 %v196_v4, %v134_v13 }
  0x3d   :  { %v198_v6 = vpop.eup %197 }
  0x3e   :  { %v124_v7 = vmul.f32 %v198_v6, %v122_v5  ;;  %v200_v15 = vpop.eup %199 }
  0x3f   :  { %v132_v23 = vmul.f32 0.6931472, %v200_v15 }
  0x40   :  { %v125_v8 = vsub.f32 2.0, %v124_v7 }
  0x41   :  { %v138_v30 = vsel %vm137_vm1, %v135_v24, %v132_v23 }
  0x42   :  { %v126_v10 = vmul.f32 %v198_v6, %v125_v8  ;;  %v139_v34 = vadd.f32 %v138_v30, %v129_v28 }
  0x44   :  { %v141_v14 = vmul.f32 %v196_v4, %v126_v10 }
  0x46   :  { %v142_v17 = vsel %vm140_vm0, %v126_v10, %v141_v14 }
  0x47   :  { %v143_v21 = vadd.f32 %v142_v17, %v116_v12  ;;  %v144_v22 = vmul.f32 2.0, %v142_v17 }
  0x49   :  { %v145_v25 = vmul.f32 %v144_v22, %v116_v12 }
  0x4b   :  { %v146_v29 = vsub.f32 %v143_v21, %v145_v25 }
  0x4d   :  { %v147_v31 = vmul.f32 %v146_v29, %v146_v29 }
  0x4f   :  { %v148_v35 = vmul.f32 0.3, %v147_v31 }
  0x51   :  { %v155_v36 = vadd.f32 %v190_v32, %v148_v35 }
  0x53   :  { %v156_v37 = vmul.f32 %v155_v36, %v139_v34 }
  0x55   :  { %v165_v38 = vsel %vm163_vm2, %v156_v37, 0.0 }
  0x56   :  { %168 = vst [vmem:[#allocation7] sm:$0xff] %v165_v38 }
  0x57   :  { %252 = shalt.err (!%p249_p0)
}
  0x58   :  { %178 = dma.vmem_to_hbm [thread:$0]  %s176_s23, 128, %s305_s3, [#allocation4]  }
  0x59   :  { %265 = dma.done.wait [#allocation4], 128  }
  0x5a   :  { %266 = vsyncadd [#allocation4], 4294967168 }
  0x5b   :  { %182 = vsyncpa [#allocation3], 1 }
  0x5c   :  { %183 = vsyncpa [#allocation6], 1 }
  0x5d   :  { %184 = vsyncpa [#allocation4], 1 }

</bundles_post_ra>
